<compile_context>
chip_gen: v5e
topology: v5e:2x2
jax: 0.10.0
libtpu: 0.0.40
codegen_flags: <defaults>
</compile_context>

<pallas_src>
import functools

import jax
import jax.numpy as jnp
from jax.experimental import pallas as pl
from jax.experimental.pallas import tpu as pltpu

HIDDEN = 32
NUM_CLASSES = 8
LANES = 128                       # vreg lane width
_X_VMEM_BUDGET = 24 * 2**20       # budget for the double-buffered x tile


def _round_up(n, m):
    return ((n + m - 1) // m) * m


# ----------------------------------------------------------------------------
# Kernel bodies
# ----------------------------------------------------------------------------
def _forward_tile(x_ref, w1_ref, b1_ref, w2_ref, b2_ref):
    # x_ref:  [TB, C, HW]   native dtype (f32 or bf16)
    # w1_ref: [C, 128]      f32, HIDDEN zero-padded to 128 lanes
    # b1_ref: [1, 128]      f32
    # w2_ref: [128, 128]    bf16, rows 0:HIDDEN / cols 0:NUM_CLASSES hold the head
    # b2_ref: [1, 128]      f32
    # Spatial mean on the VPU/XLU in f32 (accurate for bf16 inputs, no K=C*H*W matmul).
    pooled = jnp.mean(x_ref[...].astype(jnp.float32), axis=-1)            # [TB, C]
    pre = jnp.dot(pooled, w1_ref[...], preferred_element_type=jnp.float32)
    pre = jnp.maximum(pre + b1_ref[...], 0.0)                             # [TB, 128]
    logits = jnp.dot(pre.astype(jnp.bfloat16), w2_ref[...],
                     preferred_element_type=jnp.float32) + b2_ref[...]    # [TB, 128]
    return logits, pre


def _kernel_logits_pre(x_ref, w1_ref, b1_ref, w2_ref, b2_ref, logit_ref, pre_ref):
    logits, pre = _forward_tile(x_ref, w1_ref, b1_ref, w2_ref, b2_ref)
    logit_ref[...] = logits
    pre_ref[...] = pre            # direct VPU store: prelogit stays exact f32


def _kernel_logits_only(x_ref, w1_ref, b1_ref, w2_ref, b2_ref, logit_ref):
    logits, _ = _forward_tile(x_ref, w1_ref, b1_ref, w2_ref, b2_ref)
    logit_ref[...] = logits


# ----------------------------------------------------------------------------
# Tiling / VMEM sizing
# ----------------------------------------------------------------------------
def _choose_tile_b(B, C, HW, itemsize_x):
    sub = max(8, 32 // itemsize_x)          # sublane packing: 8 f32, 16 bf16, 32 i8
    if B <= sub:
        return B                            # one block equal to the full batch dim
    cap = 512 if itemsize_x >= 4 else 1024  # big tiles -> ~85% of HBM roofline
    # Keep >= 2 grid steps so the "parallel" batch axis can span both v7x TCs.
    tile = min(cap, _round_up(pl.cdiv(B, 2), sub))
    row_vmem = _round_up(C, sub) * _round_up(HW, LANES) * itemsize_x
    while tile > sub and 2 * tile * row_vmem > _X_VMEM_BUDGET:
        tile = _round_up(tile // 2, sub)
    return tile


def _vmem_limit(tile_b, C, HW, itemsize_x):
    sub_x = max(8, 32 // itemsize_x)
    x_tile = tile_b * _round_up(C, sub_x) * _round_up(HW, LANES) * itemsize_x
    w_bytes = (_round_up(C, 8) * LANES * 4        # w1 (f32)
               + 8 * LANES * 4                    # b1
               + LANES * LANES * 2                # w2 (bf16)
               + 8 * LANES * 4)                   # b2
    out_tile = _round_up(tile_b, 8) * LANES * 4
    needed = 2 * x_tile + 2 * w_bytes + 2 * 2 * out_tile   # double-buffered
    # Headroom for Mosaic internal scratch; stay well under v7x's 64 MiB physical.
    return int(min(48 * 2**20, max(16 * 2**20, needed + 8 * 2**20)))


# ----------------------------------------------------------------------------
# Model (self.model) on Pallas
# ----------------------------------------------------------------------------
def build_fused_params(params):
    """One-time weight prep (hoisted out of the per-forward path)."""
    w1p = jnp.pad(params["w1"].astype(jnp.float32),
                  ((0, 0), (0, LANES - HIDDEN)))                       # [C, 128]
    b1p = jnp.pad(params["b1"].astype(jnp.float32),
                  ((0, 0), (0, LANES - HIDDEN)))                       # [1, 128]
    w2p = jnp.zeros((LANES, LANES), jnp.float32)
    w2p = w2p.at[:HIDDEN, :NUM_CLASSES].set(params["w2"]).astype(jnp.bfloat16)
    b2p = jnp.zeros((1, LANES), jnp.float32)
    b2p = b2p.at[:, :NUM_CLASSES].set(params["b2"])
    return {"w1": w1p, "b1": b1p, "w2": w2p, "b2": b2p}


@functools.partial(jax.jit, static_argnames=("return_prelogit",))
def synthetic_model(fused, x, *, return_prelogit):
    B, C, H, W = x.shape
    HW = H * W
    x3 = x.reshape(B, C, HW)                 # contiguous view; no HBM copy
    itemsize = x.dtype.itemsize
    tile_b = _choose_tile_b(B, C, HW, itemsize)
    grid = (pl.cdiv(B, tile_b),)             # ragged tail tile handled by masking

    in_specs = [
        pl.BlockSpec((tile_b, C, HW), lambda i: (i, 0, 0)),   # x: streamed per tile
        pl.BlockSpec((C, LANES), lambda i: (0, 0)),           # w1: VMEM resident
        pl.BlockSpec((1, LANES), lambda i: (0, 0)),           # b1
        pl.BlockSpec((LANES, LANES), lambda i: (0, 0)),       # w2 (bf16)
        pl.BlockSpec((1, LANES), lambda i: (0, 0)),           # b2
    ]
    out_block = pl.BlockSpec((tile_b, LANES), lambda i: (i, 0))
    out_slab = jax.ShapeDtypeStruct((B, LANES), jnp.float32)
    cp = pltpu.CompilerParams(
        dimension_semantics=("parallel",),   # batch tiles across TCs (v7x)
        vmem_limit_bytes=_vmem_limit(tile_b, C, HW, itemsize),
    )
    args = (x3, fused["w1"], fused["b1"], fused["w2"], fused["b2"])

    if return_prelogit:
        logit_slab, pre_slab = pl.pallas_call(
            _kernel_logits_pre,
            out_shape=(out_slab, out_slab),
            grid=grid,
            in_specs=in_specs,
            out_specs=(out_block, out_block),
            compiler_params=cp,
        )(*args)
        return logit_slab[:, :NUM_CLASSES], pre_slab[:, :HIDDEN]

    logit_slab = pl.pallas_call(
        _kernel_logits_only,
        out_shape=out_slab,
        grid=grid,
        in_specs=in_specs,
        out_specs=out_block,
        compiler_params=cp,
    )(*args)
    return logit_slab[:, :NUM_CLASSES]


def dummy_forward(fused_params, x, return_prelogit):
    """Dummy.forward(x, return_prelogit) — pure delegation to the model."""
    if return_prelogit:
        return synthetic_model(fused_params, x, return_prelogit=True)
    return synthetic_model(fused_params, x, return_prelogit=False)


# ----------------------------------------------------------------------------
# Params / reference
# ----------------------------------------------------------------------------
def init_params(key, in_channels):
    k1, k2 = jax.random.split(key)
    w1 = jax.random.normal(k1, (in_channels, HIDDEN), jnp.float32) * 0.05
    b1 = jnp.zeros((1, HIDDEN), jnp.float32)
    w2 = jax.random.normal(k2, (HIDDEN, NUM_CLASSES), jnp.float32) * 0.05
    b2 = jnp.zeros((1, NUM_CLASSES), jnp.float32)
    return {"w1": w1, "b1": b1, "w2": w2, "b2": b2}


def _reference(params, x):
    pooled = jnp.mean(x.astype(jnp.float32), axis=(2, 3))            # [B, C]
    pre = jnp.maximum(pooled @ params["w1"] + params["b1"], 0.0)     # [B, HIDDEN]
    logits = pre @ params["w2"] + params["b2"]                       # [B, NUM_CLASSES]
    return logits, pre


if __name__ == "__main__":
    key = jax.random.PRNGKey(0)
    kx, kp, kx2 = jax.random.split(key, 3)

    B, C, H, W = 2, 4, 16, 16          # NCHW, matching PyTorch conv convention
    x = jax.random.normal(kx, (B, C, H, W), jnp.float32)
    params = init_params(kp, C)
    fused = build_fused_params(params)  # one-time weight prep (not per-forward)

    # return_prelogit=True path
    logits, prelogit = dummy_forward(fused, x, return_prelogit=True)
    jax.block_until_ready((logits, prelogit))
    assert logits.shape == (B, NUM_CLASSES)
    assert prelogit.shape == (B, HIDDEN)

    ref_logits, ref_pre = _reference(params, x)
    assert jnp.allclose(logits, ref_logits, atol=2e-2, rtol=2e-2)
    assert jnp.allclose(prelogit, ref_pre, atol=2e-2, rtol=2e-2)

    # return_prelogit=False path (logits-only kernel, no prelogit output traffic)
    logits_only = dummy_forward(fused, x, return_prelogit=False)
    jax.block_until_ready(logits_only)
    assert logits_only.shape == (B, NUM_CLASSES)
    assert jnp.allclose(logits_only, ref_logits, atol=2e-2, rtol=2e-2)

    # Native-dtype (bf16) DMA path, now checked numerically as well: the pool
    # runs in f32 inside the kernel, so only the x quantization differs.
    xb = x.astype(jnp.bfloat16)
    lb, pb = dummy_forward(fused, xb, return_prelogit=True)
    jax.block_until_ready((lb, pb))
    rlb, rpb = _reference(params, xb.astype(jnp.float32))
    assert jnp.allclose(lb, rlb, atol=2e-2, rtol=2e-2)
    assert jnp.allclose(pb, rpb, atol=2e-2, rtol=2e-2)

    # Ragged batch (B not a multiple of the tile): exercises the masked tail
    # tile path that replaced the whole-array jnp.pad of x.
    B2 = 10
    x2 = jax.random.normal(kx2, (B2, C, H, W), jnp.float32)
    l2, p2 = dummy_forward(fused, x2, return_prelogit=True)
    jax.block_until_ready((l2, p2))
    r2l, r2p = _reference(params, x2)
    assert l2.shape == (B2, NUM_CLASSES) and p2.shape == (B2, HIDDEN)
    assert jnp.allclose(l2, r2l, atol=2e-2, rtol=2e-2)
    assert jnp.allclose(p2, r2p, atol=2e-2, rtol=2e-2)

    print("KERNEL_OK")
</pallas_src>

<mosaic_0001>
module attributes {stable_mosaic.version = 11 : i64} {
  func.func @_kernel_logits_pre(%arg0: i32, %arg1: memref<2x4x256xf32, #tpu.memory_space<vmem>>, %arg2: memref<4x128xf32, #tpu.memory_space<vmem>>, %arg3: memref<1x128xf32, #tpu.memory_space<vmem>>, %arg4: memref<128x128xbf16, #tpu.memory_space<vmem>>, %arg5: memref<1x128xf32, #tpu.memory_space<vmem>>, %arg6: memref<2x128xf32, #tpu.memory_space<vmem>>, %arg7: memref<2x128xf32, #tpu.memory_space<vmem>>) attributes {dimension_semantics = [#tpu.dimension_semantics<parallel>], iteration_bounds = array<i64: 1>, scalar_prefetch = 0 : i64, scratch_operands = 0 : i64, tpu.core_type = #tpu.core_type<tc>, window_params = [{transform_indices = @transform_0, window_bounds = array<i64: 2, 4, 256>}, {pipeline_mode = #tpu.pipeline_mode<synchronous>, transform_indices = @transform_1, window_bounds = array<i64: 4, 128>}, {pipeline_mode = #tpu.pipeline_mode<synchronous>, transform_indices = @transform_2, window_bounds = array<i64: 1, 128>}, {pipeline_mode = #tpu.pipeline_mode<synchronous>, transform_indices = @transform_3, window_bounds = array<i64: 128, 128>}, {pipeline_mode = #tpu.pipeline_mode<synchronous>, transform_indices = @transform_4, window_bounds = array<i64: 1, 128>}, {transform_indices = @transform_5, window_bounds = array<i64: 2, 128>}, {transform_indices = @transform_6, window_bounds = array<i64: 2, 128>}]} {
    %c0 = arith.constant 0 : index
    %c0_0 = arith.constant 0 : index
    %c0_1 = arith.constant 0 : index
    %0 = vector.load %arg1[%c0, %c0_0, %c0_1] : memref<2x4x256xf32, #tpu.memory_space<vmem>>, vector<2x4x256xf32>
    %cst = arith.constant dense<0.000000e+00> : vector<2x4xf32>
    %1 = vector.multi_reduction <add>, %0, %cst [2] : vector<2x4x256xf32> to vector<2x4xf32>
    %cst_2 = arith.constant 2.560000e+02 : f32
    %2 = vector.broadcast %cst_2 : f32 to vector<2x4xf32>
    %3 = arith.divf %1, %2 : vector<2x4xf32>
    %c0_3 = arith.constant 0 : index
    %c0_4 = arith.constant 0 : index
    %4 = vector.load %arg2[%c0_3, %c0_4] : memref<4x128xf32, #tpu.memory_space<vmem>>, vector<4x128xf32>
    %cst_5 = arith.constant dense<0.000000e+00> : vector<2x128xf32>
    %5 = tpu.matmul %3, %4, %cst_5 {dimension_numbers = #tpu.dot_dimension_numbers<[1], [0], [0], [1], [0, 0, 1, 1], [], []>} : vector<2x4xf32>, vector<4x128xf32>, vector<2x128xf32> -> vector<2x128xf32>
    %c0_6 = arith.constant 0 : index
    %c0_7 = arith.constant 0 : index
    %6 = vector.load %arg3[%c0_6, %c0_7] : memref<1x128xf32, #tpu.memory_space<vmem>>, vector<1x128xf32>
    %7 = vector.broadcast %6 : vector<1x128xf32> to vector<2x128xf32>
    %8 = arith.addf %5, %7 : vector<2x128xf32>
    %cst_8 = arith.constant 0.000000e+00 : f32
    %9 = vector.broadcast %cst_8 : f32 to vector<2x128xf32>
    %10 = arith.maximumf %8, %9 : vector<2x128xf32>
    %11 = arith.truncf %10 : vector<2x128xf32> to vector<2x128xbf16>
    %c0_9 = arith.constant 0 : index
    %c0_10 = arith.constant 0 : index
    %12 = vector.load %arg4[%c0_9, %c0_10] : memref<128x128xbf16, #tpu.memory_space<vmem>>, vector<128x128xbf16>
    %cst_11 = arith.constant dense<0.000000e+00> : vector<2x128xf32>
    %13 = tpu.matmul %11, %12, %cst_11 {dimension_numbers = #tpu.dot_dimension_numbers<[1], [0], [0], [1], [0, 0, 1, 1], [], []>} : vector<2x128xbf16>, vector<128x128xbf16>, vector<2x128xf32> -> vector<2x128xf32>
    %c0_12 = arith.constant 0 : index
    %c0_13 = arith.constant 0 : index
    %14 = vector.load %arg5[%c0_12, %c0_13] : memref<1x128xf32, #tpu.memory_space<vmem>>, vector<1x128xf32>
    %15 = vector.broadcast %14 : vector<1x128xf32> to vector<2x128xf32>
    %16 = arith.addf %13, %15 : vector<2x128xf32>
    %c0_14 = arith.constant 0 : index
    %c0_15 = arith.constant 0 : index
    %17 = vector.load %arg6[%c0_14, %c0_15] : memref<2x128xf32, #tpu.memory_space<vmem>>, vector<2x128xf32>
    tpu.vector_store %arg6[%c0_14, %c0_15], %16 {strides = array<i32>} : memref<2x128xf32, #tpu.memory_space<vmem>>, vector<2x128xf32>,
    %c0_16 = arith.constant 0 : index
    %c0_17 = arith.constant 0 : index
    %18 = vector.load %arg7[%c0_16, %c0_17] : memref<2x128xf32, #tpu.memory_space<vmem>>, vector<2x128xf32>
    tpu.vector_store %arg7[%c0_16, %c0_17], %10 {strides = array<i32>} : memref<2x128xf32, #tpu.memory_space<vmem>>, vector<2x128xf32>,
    return
  }
  func.func @transform_0(%arg0: i32) -> (i32, i32, i32) {
    %c0_i32 = arith.constant 0 : i32
    %c0_i32_0 = arith.constant 0 : i32
    %c0_i32_1 = arith.constant 0 : i32
    return %arg0, %c0_i32, %c0_i32_0 : i32, i32, i32
  }
  func.func @transform_1(%arg0: i32) -> (i32, i32) {
    %c0_i32 = arith.constant 0 : i32
    %c0_i32_0 = arith.constant 0 : i32
    %c0_i32_1 = arith.constant 0 : i32
    return %c0_i32, %c0_i32_0 : i32, i32
  }
  func.func @transform_2(%arg0: i32) -> (i32, i32) {
    %c0_i32 = arith.constant 0 : i32
    %c0_i32_0 = arith.constant 0 : i32
    %c0_i32_1 = arith.constant 0 : i32
    return %c0_i32, %c0_i32_0 : i32, i32
  }
  func.func @transform_3(%arg0: i32) -> (i32, i32) {
    %c0_i32 = arith.constant 0 : i32
    %c0_i32_0 = arith.constant 0 : i32
    %c0_i32_1 = arith.constant 0 : i32
    return %c0_i32, %c0_i32_0 : i32, i32
  }
  func.func @transform_4(%arg0: i32) -> (i32, i32) {
    %c0_i32 = arith.constant 0 : i32
    %c0_i32_0 = arith.constant 0 : i32
    %c0_i32_1 = arith.constant 0 : i32
    return %c0_i32, %c0_i32_0 : i32, i32
  }
  func.func @transform_5(%arg0: i32) -> (i32, i32) {
    %c0_i32 = arith.constant 0 : i32
    %c0_i32_0 = arith.constant 0 : i32
    return %arg0, %c0_i32 : i32, i32
  }
  func.func @transform_6(%arg0: i32) -> (i32, i32) {
    %c0_i32 = arith.constant 0 : i32
    %c0_i32_0 = arith.constant 0 : i32
    return %arg0, %c0_i32 : i32, i32
  }
}

</mosaic_0001>

<bundles_post_ra>
// kernel: synthetic_model.1
= control target key start
LH: loop header
LB: loop body
LE: loop exit
PB: predicated region body
PF: predicated region fallthrough
CT: control target
= control target key end

     0   :  { %12 = vsyncpa [#allocation3], 0  ;;  %s404_s0 = inlined_call_operand.vmem [shape: f32[2,4,256], index: 0, kind: input, shape index: {}]   ;;  %s405_s1 = inlined_call_operand.vmem [shape: f32[4,128], index: 1, kind: input, shape index: {}]   ;;  %s406_s2 = inlined_call_operand.vmem [shape: f32[1,128], index: 2, kind: input, shape index: {}]   ;;  %s407_s3 = inlined_call_operand.vmem [shape: bf16[128,128], index: 3, kind: input, shape index: {}]   ;;  %s408_s4 = inlined_call_operand.vmem [shape: f32[1,128], index: 4, kind: input, shape index: {}]   ;;  %s409_s5 = inlined_call_operand.hbm [shape: f32[2,128], index: 5, kind: output, shape index: {0}]   ;;  %s410_s6 = inlined_call_operand.hbm [shape: f32[2,128], index: 6, kind: output, shape index: {1}]  }
   0x1   :  { %v24_v0 = vld [vmem:[%s404_s0] sm:$0xff]  ;;  %v25_v1 = vld [vmem:[%s404_s0 + $0x8] sm:$0xff] }
   0x2   :  { %28 = vst [vmem:[#allocation1] ss:$2 sm:$0xff] %v24_v0 }
   0x3   :  { %13 = vsyncpa [#allocation5], 0  ;;  %32 = vst [vmem:[#allocation1 + $0x10] ss:$2 sm:$0xff] %v25_v1  ;;  %vm39_vm0 = vcmask 1043456   ;;  %v316_v12 = vmov 256.0   ;;  %v66_v26 = vlaneseq }
   0x4   :  { %262 = vrcp.f32 %v316_v12  ;;  %v59_v13 = vld [vmem:[%s405_s1] sm:$0xf]  ;;  %v256_v14 = vld [vmem:[%s407_s3 + $0x38] sm:$0xff]  ;;  %v255_v15 = vld [vmem:[%s407_s3 + $0x30] sm:$0xff]  ;;  %vm70_vm2 = vcmask 1041409   ;;  %vm72_vm3 = vcmask 31744  }
   0x5   :  { %215 = vmatpush.msk.msra.mxu0 %vm39_vm0, %v59_v13  ;;  %168 = vmatpush.bf16.msra.mxu1 %v256_v14  ;;  %v254_v18 = vld [vmem:[%s407_s3 + $0x28] sm:$0xff]  ;;  %v253_v20 = vld [vmem:[%s407_s3 + $0x20] sm:$0xff]  ;;  %v252_v22 = vld [vmem:[%s407_s3 + $0x18] sm:$0xff]  ;;  %v67_v28 = vand.u32 127, %v66_v26  ;;  %s317_s19 = smov [#allocation4]   ;;  %s201_s23 = sshll.u32 %s410_s6, 4  ;;  %s202_s23 = int_to_ptr.hbm [resolvable:$true] %s201_s23 }
   0x6   :  { %v251_v25 = vld [vmem:[%s407_s3 + $0x10] sm:$0xff]  ;;  %v250_v35 = vld [vmem:[%s407_s3 + $0x8] sm:$0xff]  ;;  %v249_v36 = vld [vmem:[%s407_s3] sm:$0xff]  ;;  %s199_s20 = sshll.u32 %s317_s19, 4  ;;  %s190_s27 = sshll.u32 %s409_s5, 4  ;;  %s200_s20 = int_to_ptr.vmem [resolvable:$true] %s199_s20  ;;  %s191_s27 = int_to_ptr.hbm [resolvable:$true] %s190_s27 }
   0x7   :  { %v260_v37 = vld [vmem:[%s406_s2] ss:$0 sm:$0xff]  ;;  %s318_s2 = smov [#allocation2]  }
   0x8   :  { %v261_v42 = vld [vmem:[%s408_s4] ss:$0 sm:$0xff]  ;;  %s188_s0 = sshll.u32 %s318_s2, 4  ;;  %s189_s0 = int_to_ptr.vmem [resolvable:$true] %s188_s0 }
   0x9   :  { %v29_v2 = vld.sshfl [vmem:[#allocation1] sm:$0xff pattern:$0x75316420]  ;;  %v30_v3 = vld.sshfl [vmem:[#allocation1 + $0x8] sm:$0xff pattern:$0x75316420]  ;;  %169 = vmatpush.bf16.msra.mxu1 %v255_v15 }
   0xa   :  { %v40_v4 = vsel %vm39_vm0, %v29_v2, 0.0  ;;  %v41_v5 = vsel %vm39_vm0, %v30_v3, 0.0  ;;  %v33_v7 = vld.sshfl [vmem:[#allocation1 + $0x10] sm:$0xff pattern:$0x75316420]  ;;  %v263_v16 = vpop.eup %262 }
   0xb   :  { %v42_v6 = vadd.f32 %v41_v5, %v40_v4  ;;  %v34_v8 = vld.sshfl [vmem:[#allocation1 + $0x18] sm:$0xff pattern:$0x75316420]  ;;  %v45_v9 = vsel %vm39_vm0, %v33_v7, 0.0  ;;  %v51_v17 = vmul.f32 256.0, %v263_v16  ;;  %vm55_vm1 = vweird.f32 %v263_v16 }
   0xc   :  { %v46_v10 = vsel %vm39_vm0, %v34_v8, 0.0 }
   0xd   :  { %43 = vadd.xlane.f32.xlu0 %v42_v6  ;;  %v47_v11 = vadd.f32 %v46_v10, %v45_v9  ;;  %v52_v19 = vsub.f32 1.0, %v51_v17  ;;  %170 = vmatpush.bf16.msra.mxu1 %v254_v18 }
   0xf   :  { %v53_v21 = vmul.f32 %v263_v16, %v52_v19 }
  0x11   :  { %171 = vmatpush.bf16.msra.mxu1 %v253_v20  ;;  %v54_v23 = vadd.f32 %v263_v16, %v53_v21 }
  0x13   :  { %v56_v27 = vsel %vm55_vm1, %v263_v16, %v54_v23 }
  0x15   :  { %48 = vadd.xlane.f32.xlu0 %v47_v11  ;;  %172 = vmatpush.bf16.msra.mxu1 %v252_v22 }
  0x19   :  { %173 = vmatpush.bf16.msra.mxu1 %v251_v25 }
  0x1d   :  { %174 = vmatpush.bf16.msra.mxu1 %v250_v35 }
  0x21   :  { %175 = vmatpush.bf16.msra.mxu1 %v249_v36 }
  0x80   :  { %v44_v24 = vpop.xlane.xlu0 %43 }
  0x81   :  { %v57_v29 = vmul.f32 %v56_v27, %v44_v24 }
  0x83   :  { %v68_v32 = vperm.slane %v57_v29, %v67_v28 }
  0x88   :  { %v49_v30 = vpop.xlane.xlu0 %48 }
  0x89   :  { %v58_v31 = vmul.f32 %v56_v27, %v49_v30 }
  0x8b   :  { %v69_v33 = vperm.slane %v58_v31, %v67_v28 }
  0x8d   :  { %v71_v34 = vsel %vm70_vm2, %v69_v33, %v68_v32 }
  0x8e   :  { %216 = vmatmul.msk.f32.vlgmr.msra.gmra.mxu0 %vm72_vm3, %v71_v34 }
 0x10b   :  { %v95_v38 = vpop.f32.mrf.mxu0 }
 0x10c   :  { %v96_v39 = vadd.f32 %v260_v37, %v95_v38 }
 0x10e   :  { %v98_v40 = vmax.f32 %v96_v39, 0.0 }
 0x110   :  { %182 = vst [vmem:[#allocation4] sm:$0x3] %v98_v40  ;;  %v99_v41 = vpack.c.bf16 %v98_v40, %v98_v40 }
 0x111   :  { %204 = dma.vmem_to_hbm [thread:$0]  %s200_s20, 32, %s202_s23, [#allocation5]  }
 0x112   :  { %176 = vmatmul.bf16.vlgmr.msra.gmra.mxu1 %v99_v41 }
 0x18f   :  { %v177_v43 = vpop.f32.mrf.mxu1 }
 0x190   :  { %v178_v44 = vadd.f32 %v261_v42, %v177_v43 }
 0x192   :  { %181 = vst [vmem:[#allocation2] sm:$0x3] %v178_v44 }
 0x193   :  { %193 = dma.vmem_to_hbm [thread:$0]  %s189_s0, 32, %s191_s27, [#allocation3]  }
 0x197   :  { %v179_v45 = vpop.f32.mrf.mxu1 }
 0x198   :  { %312 = dma.done.wait [#allocation3], 32  }
 0x199   :  { %313 = vsyncadd [#allocation3], 4294967264 }
 0x19a   :  { %314 = dma.done.wait [#allocation5], 32  }
 0x19b   :  { %315 = vsyncadd [#allocation5], 4294967264 }
 0x19c   :  { %213 = vsyncpa [#allocation3], 1 }
 0x19d   :  { %214 = vsyncpa [#allocation5], 1 }

</bundles_post_ra>
